<compile_context>
chip_gen: v6e
topology: v6e:2x2x1
jax: 0.10.0
libtpu: 0.0.40
codegen_flags: <defaults>
</compile_context>

<pallas_src>
from collections import defaultdict
import math

import numpy as np
import jax
import jax.numpy as jnp
from jax.experimental import pallas as pl
from jax.experimental.pallas import tpu as pltpu

DEFAULT_ROW_TILE = 256   # rows per grid step; cap near median per-task group size
LANE = 128               # lane width for padding H / O


def _round_up(x, m):
    return (x + m - 1) // m * m


# ---------------------------------------------------------------------------
# Pallas kernel: grouped fused 2-layer MLP. One grid step = one TM-row tile of
# same-task nodes; tid_ref (scalar prefetch) selects that tile's task weights.
# ---------------------------------------------------------------------------
def _grouped_mlp_kernel(tid_ref, x_ref, w1_ref, b1_ref, w2_ref, b2_ref, o_ref):
    del tid_ref  # consumed by the index_maps
    # x:[TM,Hp] bf16, w1:[Hp,Hp] bf16, b1:[1,Hp] f32, w2:[Hp,Op] bf16, b2:[1,Op] f32
    h = jnp.dot(x_ref[...], w1_ref[...], preferred_element_type=jnp.float32)
    h = jnp.maximum(h + b1_ref[...], 0.0)                 # f32 bias + relu (VPU)
    y = jnp.dot(h.astype(jnp.bfloat16), w2_ref[...],
                preferred_element_type=jnp.float32)
    o_ref[...] = y + b2_ref[...]


def _grouped_mlp_call(tile_tid, xs, w1, b1, w2, b2):
    num_tiles = tile_tid.shape[0]
    mp, hp = xs.shape
    tm = mp // num_tiles
    op = w2.shape[-1]

    # v7x has 64 MiB VMEM/TC: once weights get large, single-buffer them
    # (they only change at task boundaries because tiles are sorted by task).
    single_buffer_weights = hp >= 1024
    wkw = ({"pipeline_mode": pl.Buffered(1)} if single_buffer_weights else {})
    wbuf = 1 if single_buffer_weights else 2
    # TODO(synk): add a K-tiling grid axis + f32 accumulator scratch once
    # Hp exceeds ~2048 so whole W1 need not be VMEM-resident.

    # Explicit scoped-VMEM limit from the per-step footprint (defaults are
    # 16 MiB on v5e / 32 MiB on v6e+, well below physical).
    footprint = (2 * tm * hp * 2                    # x tile bf16, double-buffered
                 + 2 * tm * op * 4                  # out tile f32, double-buffered
                 + wbuf * (hp * hp + hp * op) * 2   # W1, W2 bf16
                 + wbuf * (hp + op) * 4)            # biases f32
    vmem_limit = int(min(max(footprint + (2 << 20), 16 << 20), 100 << 20))

    return pl.pallas_call(
        _grouped_mlp_kernel,
        out_shape=jax.ShapeDtypeStruct((mp, op), jnp.float32),
        grid_spec=pltpu.PrefetchScalarGridSpec(
            num_scalar_prefetch=1,
            grid=(num_tiles,),
            in_specs=[
                pl.BlockSpec((tm, hp), lambda i, tid: (i, 0)),                        # node rows
                pl.BlockSpec((None, hp, hp), lambda i, tid: (tid[i], 0, 0), **wkw),   # W1[task]
                pl.BlockSpec((None, 1, hp), lambda i, tid: (tid[i], 0, 0), **wkw),    # b1[task]
                pl.BlockSpec((None, hp, op), lambda i, tid: (tid[i], 0, 0), **wkw),   # W2[task]
                pl.BlockSpec((None, 1, op), lambda i, tid: (tid[i], 0, 0), **wkw),    # b2[task]
            ],
            out_specs=pl.BlockSpec((tm, op), lambda i, tid: (i, 0)),
        ),
        compiler_params=pltpu.CompilerParams(
            dimension_semantics=("parallel",),      # row tiles shard across v7x TCs
            vmem_limit_bytes=vmem_limit),
    )(tile_tid, xs, w1, b1, w2, b2)
    # TODO(synk): on v7x, order tiles so the megacore split falls on a task
    # boundary (whole same-tid runs per core) to keep weight DMA amortized.


@jax.jit
def _grouped_forward(node_features, gather_idx, unsort_idx, tile_tid,
                     w1, b1, w2, b2):
    """bf16 gather/pad -> grouped MLP kernel -> scatter back; one dispatch."""
    _, h = node_features.shape
    hp = w1.shape[-1]
    xb = node_features.astype(jnp.bfloat16)          # cast first (half the traffic)
    xs = jnp.take(xb, gather_idx, axis=0)             # [Mp, H] bf16, task-sorted
    if h < hp:
        xs = jnp.pad(xs, ((0, 0), (0, hp - h)))       # [Mp, Hp] bf16
    out_sorted = _grouped_mlp_call(tile_tid, xs, w1, b1, w2, b2)   # [Mp, Op] f32
    # Single gather back to original node order (rows of unrouted nodes are
    # never read by the caller).
    return jnp.take(out_sorted, unsort_idx, axis=0)                # [N, Op]


# ---------------------------------------------------------------------------
# Deterministic parameter init (xavier-uniform weights, like _reset_params)
# ---------------------------------------------------------------------------
def _xavier_uniform(key, fan_in, fan_out):
    bound = math.sqrt(6.0 / (fan_in + fan_out))
    return jax.random.uniform(key, (fan_in, fan_out), jnp.float32, -bound, bound)


def make_task_network(key, hidden_dim, out_dim):
    k1, k2, k3, k4 = jax.random.split(key, 4)
    return {
        "w1": _xavier_uniform(k1, hidden_dim, hidden_dim),
        "b1": jax.random.uniform(k2, (hidden_dim,), jnp.float32, -0.1, 0.1),
        "w2": _xavier_uniform(k3, hidden_dim, out_dim),
        "b2": jax.random.uniform(k4, (out_dim,), jnp.float32, -0.1, 0.1),
    }


# ---------------------------------------------------------------------------
# MultiTaskConnector: routing glue mirroring `multi_tasking`
# ---------------------------------------------------------------------------
class MultiTaskConnectorPallas:
    def __init__(self, hidden_dim, task_networks, row_tile=DEFAULT_ROW_TILE):
        self.hidden_dim = hidden_dim
        self.task_networks = task_networks
        self.row_tile = int(row_tile)
        self.task_names = sorted(task_networks.keys())
        self.task_to_id = {t: i for i, t in enumerate(self.task_names)}
        self.out_dims = {t: int(task_networks[t]["w2"].shape[1])
                         for t in self.task_names}
        self._routing_cache = {}

        hp = _round_up(max(hidden_dim, 1), LANE)
        op = _round_up(max(self.out_dims.values(), default=1), LANE)
        self.hp, self.op = hp, op

        # Pre-pad + stack + bf16-cast all task weights ONCE (no per-call padding).
        T = max(len(self.task_names), 1)
        w1 = np.zeros((T, hp, hp), np.float32)
        b1 = np.zeros((T, 1, hp), np.float32)
        w2 = np.zeros((T, hp, op), np.float32)
        b2 = np.zeros((T, 1, op), np.float32)
        for t, name in enumerate(self.task_names):
            p = task_networks[name]
            h = int(p["w1"].shape[0])
            o = int(p["w2"].shape[1])
            w1[t, :h, :h] = np.asarray(p["w1"], np.float32)
            b1[t, 0, :h] = np.asarray(p["b1"], np.float32)
            w2[t, :h, :o] = np.asarray(p["w2"], np.float32)
            b2[t, 0, :o] = np.asarray(p["b2"], np.float32)
        self.w1 = jnp.asarray(w1, jnp.bfloat16)
        self.b1 = jnp.asarray(b1, jnp.float32)
        self.w2 = jnp.asarray(w2, jnp.bfloat16)
        self.b2 = jnp.asarray(b2, jnp.float32)

    def __call__(self, node_features, node_task_names):
        return self.multi_tasking(node_features, node_task_names)

    # ---- routing glue (NumPy, memoized per task layout) -------------------
    def _build_routing(self, node_task_names):
        key = tuple(node_task_names)
        if key in self._routing_cache:
            return self._routing_cache[key]

        n = len(node_task_names)
        task_ids = np.full((n,), -1, np.int64)
        for i, t in enumerate(node_task_names):
            if t is not None and t != "autoencoder":
                task_ids[i] = self.task_to_id[t]
        routed_mask = task_ids >= 0

        routing = None
        if routed_mask.any():
            gather_chunks = []
            tile_tid = []
            unsort = np.zeros((n,), np.int32)
            offset = 0
            for tid in np.unique(task_ids[routed_mask]):
                idxs = np.nonzero(task_ids == tid)[0].astype(np.int32)
                g = len(idxs)
                padded = _round_up(g, self.row_tile)
                chunk = np.full((padded,), idxs[0], np.int32)  # pad rows = dup row
                chunk[:g] = idxs
                gather_chunks.append(chunk)
                tile_tid.extend([int(tid)] * (padded // self.row_tile))
                unsort[idxs] = offset + np.arange(g, dtype=np.int32)
                offset += padded
            routing = (jnp.asarray(np.concatenate(gather_chunks)),
                       jnp.asarray(unsort),
                       jnp.asarray(np.asarray(tile_tid, np.int32)))

        self._routing_cache[key] = routing
        return routing

    def multi_tasking(self, node_features, node_task_names):
        routing = self._build_routing(node_task_names)

        out_np = None
        if routing is not None:
            gather_idx, unsort_idx, tile_tid = routing
            out_all = _grouped_forward(
                jnp.asarray(node_features), gather_idx, unsort_idx, tile_tid,
                self.w1, self.b1, self.w2, self.b2)       # [N, Op] f32, node order
            # ONE device->host transfer; all per-node slicing happens in NumPy
            # (no per-node device slices / dispatches).
            out_np = np.asarray(jax.device_get(out_all))

        # Per-node output list, mirroring the reference fan-out exactly:
        # routed tasks get their MLP output row, task None / 'autoencoder' -> None.
        # TODO(synk): task None / 'autoencoder' produce None in the reference;
        # there is no compute to translate for them.
        outputs = []
        for i, t in enumerate(node_task_names):
            if t is None or t == "autoencoder":
                outputs.append(None)
            else:
                outputs.append(out_np[i, :self.out_dims[t]])
        return outputs


# ---------------------------------------------------------------------------
# Pure-JAX reference (mimics the kernel's bf16-operand / f32-accumulate math)
# ---------------------------------------------------------------------------
def _ref_mlp(x, p):
    xb = x.astype(jnp.bfloat16)
    w1b = p["w1"].astype(jnp.bfloat16)
    w2b = p["w2"].astype(jnp.bfloat16)
    h = jnp.maximum(
        jnp.dot(xb, w1b, preferred_element_type=jnp.float32) + p["b1"], 0.0)
    return jnp.dot(h.astype(jnp.bfloat16), w2b,
                   preferred_element_type=jnp.float32) + p["b2"]


if __name__ == "__main__":
    hidden_dim = 32
    n_nodes = 8
    key = jax.random.PRNGKey(0)
    k_feat, k_sent, k_topic = jax.random.split(key, 3)

    # Batch-tree node features and per-node task assignments.
    node_features = jax.random.normal(k_feat, (n_nodes, hidden_dim), jnp.float32)
    node_task_names = ["sentiment", "topic", "autoencoder", None,
                       "sentiment", "topic", "sentiment", None]

    task_networks = {
        "sentiment": make_task_network(k_sent, hidden_dim, 5),
        "topic": make_task_network(k_topic, hidden_dim, 3),
    }

    connector = MultiTaskConnectorPallas(hidden_dim, task_networks)
    outputs = connector(node_features, node_task_names)
    outputs = jax.block_until_ready(outputs)

    # Verify against the pure-JAX reference.
    for i, (out, task) in enumerate(zip(outputs, node_task_names)):
        if task is None or task == "autoencoder":
            assert out is None
        else:
            ref = _ref_mlp(node_features[i], task_networks[task])
            assert out.shape == ref.shape, (out.shape, ref.shape)
            assert jnp.allclose(out, ref, atol=2e-3, rtol=2e-3), (
                f"mismatch at node {i} task {task}: {out} vs {ref}")

    # Second call with the same task layout exercises the routing memo-cache.
    _ = jax.block_until_ready(connector(node_features, node_task_names))

    print("KERNEL_OK")
</pallas_src>

<mosaic_0001>
module attributes {stable_mosaic.version = 11 : i64} {
  func.func @_grouped_mlp_kernel(%arg0: i32, %arg1: memref<2xi32, #tpu.memory_space<smem>>, %arg2: memref<256x128xbf16, #tpu.memory_space<vmem>>, %arg3: memref<1x128x128xbf16, #tpu.memory_space<vmem>>, %arg4: memref<1x1x128xf32, #tpu.memory_space<vmem>>, %arg5: memref<1x128x128xbf16, #tpu.memory_space<vmem>>, %arg6: memref<1x1x128xf32, #tpu.memory_space<vmem>>, %arg7: memref<256x128xf32, #tpu.memory_space<vmem>>) attributes {dimension_semantics = [#tpu.dimension_semantics<parallel>], iteration_bounds = array<i64: 2>, scalar_prefetch = 1 : i64, scratch_operands = 0 : i64, tpu.core_type = #tpu.core_type<tc>, window_params = [{transform_indices = @transform_0, window_bounds = array<i64: 256, 128>}, {transform_indices = @transform_1, window_bounds = array<i64: 1, 128, 128>}, {transform_indices = @transform_2, window_bounds = array<i64: 1, 1, 128>}, {transform_indices = @transform_3, window_bounds = array<i64: 1, 128, 128>}, {transform_indices = @transform_4, window_bounds = array<i64: 1, 1, 128>}, {transform_indices = @transform_5, window_bounds = array<i64: 256, 128>}]} {
    %c0 = arith.constant 0 : index
    %c0_0 = arith.constant 0 : index
    %0 = vector.load %arg2[%c0, %c0_0] : memref<256x128xbf16, #tpu.memory_space<vmem>>, vector<256x128xbf16>
    %c0_1 = arith.constant 0 : index
    %c0_2 = arith.constant 0 : index
    %c0_3 = arith.constant 0 : index
    %1 = vector.load %arg3[%c0_1, %c0_2, %c0_3] : memref<1x128x128xbf16, #tpu.memory_space<vmem>>, vector<1x128x128xbf16>
    %2 = vector.shape_cast %1 : vector<1x128x128xbf16> to vector<128x128xbf16>
    %cst = arith.constant dense<0.000000e+00> : vector<256x128xf32>
    %3 = tpu.matmul %0, %2, %cst {dimension_numbers = #tpu.dot_dimension_numbers<[1], [0], [0], [1], [0, 0, 1, 1], [], []>} : vector<256x128xbf16>, vector<128x128xbf16>, vector<256x128xf32> -> vector<256x128xf32>
    %c0_4 = arith.constant 0 : index
    %c0_5 = arith.constant 0 : index
    %c0_6 = arith.constant 0 : index
    %4 = vector.load %arg4[%c0_4, %c0_5, %c0_6] : memref<1x1x128xf32, #tpu.memory_space<vmem>>, vector<1x1x128xf32>
    %5 = vector.shape_cast %4 : vector<1x1x128xf32> to vector<1x128xf32>
    %6 = vector.broadcast %5 : vector<1x128xf32> to vector<256x128xf32>
    %7 = arith.addf %3, %6 : vector<256x128xf32>
    %cst_7 = arith.constant 0.000000e+00 : f32
    %8 = vector.broadcast %cst_7 : f32 to vector<256x128xf32>
    %9 = arith.maximumf %7, %8 : vector<256x128xf32>
    %10 = arith.truncf %9 : vector<256x128xf32> to vector<256x128xbf16>
    %c0_8 = arith.constant 0 : index
    %c0_9 = arith.constant 0 : index
    %c0_10 = arith.constant 0 : index
    %11 = vector.load %arg5[%c0_8, %c0_9, %c0_10] : memref<1x128x128xbf16, #tpu.memory_space<vmem>>, vector<1x128x128xbf16>
    %12 = vector.shape_cast %11 : vector<1x128x128xbf16> to vector<128x128xbf16>
    %cst_11 = arith.constant dense<0.000000e+00> : vector<256x128xf32>
    %13 = tpu.matmul %10, %12, %cst_11 {dimension_numbers = #tpu.dot_dimension_numbers<[1], [0], [0], [1], [0, 0, 1, 1], [], []>} : vector<256x128xbf16>, vector<128x128xbf16>, vector<256x128xf32> -> vector<256x128xf32>
    %c0_12 = arith.constant 0 : index
    %c0_13 = arith.constant 0 : index
    %c0_14 = arith.constant 0 : index
    %14 = vector.load %arg6[%c0_12, %c0_13, %c0_14] : memref<1x1x128xf32, #tpu.memory_space<vmem>>, vector<1x1x128xf32>
    %15 = vector.shape_cast %14 : vector<1x1x128xf32> to vector<1x128xf32>
    %16 = vector.broadcast %15 : vector<1x128xf32> to vector<256x128xf32>
    %17 = arith.addf %13, %16 : vector<256x128xf32>
    %c0_15 = arith.constant 0 : index
    %c0_16 = arith.constant 0 : index
    %18 = vector.load %arg7[%c0_15, %c0_16] : memref<256x128xf32, #tpu.memory_space<vmem>>, vector<256x128xf32>
    tpu.vector_store %arg7[%c0_15, %c0_16], %17 {strides = array<i32>} : memref<256x128xf32, #tpu.memory_space<vmem>>, vector<256x128xf32>,
    return
  }
  func.func @transform_0(%arg0: i32, %arg1: memref<2xi32, #tpu.memory_space<smem>>) -> (i32, i32) {
    %c0_i32 = arith.constant 0 : i32
    %c0_i32_0 = arith.constant 0 : i32
    return %arg0, %c0_i32 : i32, i32
  }
  func.func @transform_1(%arg0: i32, %arg1: memref<2xi32, #tpu.memory_space<smem>>) -> (i32, i32, i32) {
    %0 = arith.index_cast %arg0 : i32 to index
    %1 = memref.load %arg1[%0] : memref<2xi32, #tpu.memory_space<smem>>
    %c0_i32 = arith.constant 0 : i32
    %c0_i32_0 = arith.constant 0 : i32
    %c0_i32_1 = arith.constant 0 : i32
    return %1, %c0_i32, %c0_i32_0 : i32, i32, i32
  }
  func.func @transform_2(%arg0: i32, %arg1: memref<2xi32, #tpu.memory_space<smem>>) -> (i32, i32, i32) {
    %0 = arith.index_cast %arg0 : i32 to index
    %1 = memref.load %arg1[%0] : memref<2xi32, #tpu.memory_space<smem>>
    %c0_i32 = arith.constant 0 : i32
    %c0_i32_0 = arith.constant 0 : i32
    %c0_i32_1 = arith.constant 0 : i32
    return %1, %c0_i32, %c0_i32_0 : i32, i32, i32
  }
  func.func @transform_3(%arg0: i32, %arg1: memref<2xi32, #tpu.memory_space<smem>>) -> (i32, i32, i32) {
    %0 = arith.index_cast %arg0 : i32 to index
    %1 = memref.load %arg1[%0] : memref<2xi32, #tpu.memory_space<smem>>
    %c0_i32 = arith.constant 0 : i32
    %c0_i32_0 = arith.constant 0 : i32
    %c0_i32_1 = arith.constant 0 : i32
    return %1, %c0_i32, %c0_i32_0 : i32, i32, i32
  }
  func.func @transform_4(%arg0: i32, %arg1: memref<2xi32, #tpu.memory_space<smem>>) -> (i32, i32, i32) {
    %0 = arith.index_cast %arg0 : i32 to index
    %1 = memref.load %arg1[%0] : memref<2xi32, #tpu.memory_space<smem>>
    %c0_i32 = arith.constant 0 : i32
    %c0_i32_0 = arith.constant 0 : i32
    %c0_i32_1 = arith.constant 0 : i32
    return %1, %c0_i32, %c0_i32_0 : i32, i32, i32
  }
  func.func @transform_5(%arg0: i32, %arg1: memref<2xi32, #tpu.memory_space<smem>>) -> (i32, i32) {
    %c0_i32 = arith.constant 0 : i32
    %c0_i32_0 = arith.constant 0 : i32
    return %arg0, %c0_i32 : i32, i32
  }
}

</mosaic_0001>

<bundles_post_ra>
// kernel: _grouped_forward.1
= control target key start
LH: loop header
LB: loop body
LE: loop exit
PB: predicated region body
PF: predicated region fallthrough
CT: control target
= control target key end

     0   :  { %s1569_s0 = inlined_call_operand.vmem [shape: s32[2], index: 0, kind: input, shape index: {}]   ;;  %s1570_s1 = inlined_call_operand.vmem [shape: bf16[512,128], index: 1, kind: input, shape index: {}]   ;;  %s1571_s2 = inlined_call_operand.vmem [shape: bf16[2,128,128], index: 2, kind: input, shape index: {}]   ;;  %s1572_s3 = inlined_call_operand.vmem [shape: f32[2,1,128], index: 3, kind: input, shape index: {}]   ;;  %s1573_s4 = inlined_call_operand.vmem [shape: bf16[2,128,128], index: 4, kind: input, shape index: {}]   ;;  %s1574_s5 = inlined_call_operand.vmem [shape: f32[2,1,128], index: 5, kind: input, shape index: {}]   ;;  %s1575_s6 = inlined_call_operand.vmem [shape: f32[512,128], index: 6, kind: output, shape index: {}]  }
   0x1   :  { %s11_s23 = sshll.u32 %s1569_s0, 4  ;;  %s12_s23 = int_to_ptr.vmem [resolvable:$true] %s11_s23 }
   0x2   :  { %s1338_s24 = scalar_lea.vmem %s12_s23, 16  ;;  %p1343_p1 = scmp.lt.s32.totalorder %s12_s23, %s12_s23 }
   0x3   :  { %p1339_p0 = scmp.ne.s32.totalorder %s12_s23, %s1338_s24  ;;  %p1344_p2 = scmp.lt.s32.totalorder %s1338_s24, %s1338_s24 }
   0x5   :  { %p1345_p3 = por %p1344_p2, %p1343_p1 }
   0x7   :  { %p1346_p4 = pnand %p1345_p3, %p1339_p0 }
   0x9   :  { %1349 = shalt.err (!%p1346_p4)  }
   0xa   :  { %s1360_s25 = smov [#allocation3]  }
   0xb   :  { %14 = dma.vmem_to_smem %s12_s23, 16, %s1360_s25, [#allocation2] }
   0xc   :  { %1354 = dma.done.wait [#allocation2], 16 }
   0xd   :  { %1355 = vsyncadd [#allocation2], 4294967280 }
   0xe   :  { %16 = sfence }
   0xf   :  { %s1399_s26 = smov 0  }
  0x10 LB: > { %s1405_s0 = sadd.s32 4294967295, %s1358_s26   ;;  %p1106_p5 = scmp.ge.s32.totalorder %s1358_s26, 1  ;;  %s1358_s26 = sphi %s1399_s26, %s22_s26  }
  0x11   : > { %p247_p6 = scmp.lt.s32.totalorder %s1358_s26, 3 }
  0x13   : > { %p248_p7 = pnand %p1106_p5, %p247_p6 }
  0x14   : > { %s301_s27 = sld [smem:[#allocation3 + %s1405_s0]] (!%p248_p7)  ;;  %s1107_s28 = sshll.u32 (!%p248_p7), %s1405_s0, 5 }
  0x15   : > { %251 = sbr.rel (%p248_p7) target bundleno = 528 (0x210), region = 40  ;;  %p296_p8 = scmp.lt.s32.totalorder (!%p248_p7), %s1107_s28, 63 }
  0x16   : > { %s313_s9 = sld [smem:[#allocation3 + %s1405_s0]] (!%p248_p7) }
  0x17   : > { %s308_s18 = sld [smem:[#allocation3 + %s1405_s0]] (!%p248_p7) }
  0x18   : > { %s320_s22 = sld [smem:[#allocation3 + %s1405_s0]] (!%p248_p7) }
  0x1a   : > { %s1577_s28 = smov (!%p296_p8, %s1107_s28), 63  ;;  %p302_p9 = scmp.lt.s32.totalorder %s301_s27, 1 }
  0x1b   : > { %s1108_s29 = sshll.u32 %s1577_s28, 2 }
  0x1c   : > { %s1417_s8 = scalar_lea.vmem %s1570_s1, %s1108_s29  ;;  %s1579_s27 = smov (!%p302_p9, %s301_s27), 1 }
  0x1d   : > { %v1314_v0 = vld [vmem:[%s1417_s8] sm:$0xff]   ;;  %s1151_s10 = sshll.u32 %s1579_s27, 6  ;;  %p314_p10 = scmp.lt.s32.totalorder %s313_s9, 1  ;;  %v1315_v13 = vld [vmem:[%s1417_s8 + $0x8] sm:$0xff]   ;;  %v1316_v14 = vld [vmem:[%s1417_s8 + $0x10] sm:$0xff]  }
  0x1e   : > { %1217 = vmatprep.mubr.bf16.mxu0 %v1314_v0  ;;  %s306_s13 = scalar_lea.vmem %s1571_s2, %s1151_s10  ;;  %v1317_v16 = vld [vmem:[%s1417_s8 + $0x18] sm:$0xff]   ;;  %v1318_v17 = vld [vmem:[%s1417_s8 + $0x20] sm:$0xff]   ;;  %v1319_v18 = vld [vmem:[%s1417_s8 + $0x28] sm:$0xff]   ;;  %p309_p11 = scmp.lt.s32.totalorder %s308_s18, 1 }
  0x1f   : > { %v1306_v1 = vld [vmem:[%s306_s13 + $0x38] sm:$0xff]   ;;  %v1307_v2 = vld [vmem:[%s306_s13 + $0x30] sm:$0xff]   ;;  %v1308_v3 = vld [vmem:[%s306_s13 + $0x28] sm:$0xff]   ;;  %s1581_s9 = smov (!%p314_p10, %s313_s9), 1  ;;  %p321_p12 = scmp.lt.s32.totalorder %s320_s22, 1 }
  0x20   : > { %1201 = vmatprep.subr.bf16.mxu0 %v1306_v1  ;;  %v1309_v4 = vld [vmem:[%s306_s13 + $0x20] sm:$0xff]   ;;  %v1310_v5 = vld [vmem:[%s306_s13 + $0x18] sm:$0xff]   ;;  %s1152_s14 = sshll.u32 %s1581_s9, 6  ;;  %v1311_v6 = vld [vmem:[%s306_s13 + $0x10] sm:$0xff]   ;;  %s1583_s18 = smov (!%p309_p11, %s308_s18), 1 }
  0x21   : > { %1202 = vmatpush3.bf16.msra.mxu0 %v1306_v1  ;;  %s1427_s17 = scalar_lea.vmem %s1573_s4, %s1152_s14  ;;  %v1312_v7 = vld [vmem:[%s306_s13 + $0x8] sm:$0xff]   ;;  %v1313_v10 = vld [vmem:[%s306_s13] sm:$0xff]   ;;  %v1320_v19 = vld [vmem:[%s1417_s8 + $0x30] sm:$0xff]   ;;  %s311_s21 = scalar_lea.vmem %s1572_s3, %s1583_s18 }
  0x22   : > { %1203 = vmatprep.subr.bf16.mxu0 %v1307_v2  ;;  %v1330_v8 = vld [vmem:[%s1427_s17 + $0x38] sm:$0xff]   ;;  %v1331_v9 = vld [vmem:[%s1427_s17 + $0x30] sm:$0xff]   ;;  %v1332_v11 = vld [vmem:[%s1427_s17 + $0x28] sm:$0xff]   ;;  %s1585_s22 = smov (!%p321_p12, %s320_s22), 1  ;;  %s1114_s27 = sshll.u32 %s1577_s28, 3 }
  0x23   : > { %1249 = vmatprep.subr.bf16.mxu1 %v1330_v8  ;;  %v1333_v12 = vld [vmem:[%s1427_s17 + $0x20] sm:$0xff]   ;;  %v1334_v15 = vld [vmem:[%s1427_s17 + $0x18] sm:$0xff]   ;;  %v1323_v22 = vld [vmem:[%s1417_s8 + $0x48] sm:$0xff]   ;;  %s323_s25 = scalar_lea.vmem %s1574_s5, %s1585_s22  ;;  %s1500_s7 = scalar_lea.vmem %s1575_s6, %s1114_s27 }
  0x24   : > { %1250 = vmatpush3.bf16.msra.mxu1 %v1330_v8  ;;  %v1321_v20 = vld [vmem:[%s1417_s8 + $0x38] sm:$0xff]   ;;  %v1322_v21 = vld [vmem:[%s1417_s8 + $0x40] sm:$0xff]   ;;  %v1324_v23 = vld [vmem:[%s1417_s8 + $0x50] sm:$0xff]  }
  0x25   : > { %1204 = vmatpush3.bf16.msra.mxu0 %v1307_v2  ;;  %1251 = vmatprep.subr.bf16.mxu1 %v1331_v9  ;;  %v1325_v24 = vld [vmem:[%s1417_s8 + $0x58] sm:$0xff]   ;;  %v1326_v25 = vld [vmem:[%s1417_s8 + $0x60] sm:$0xff]   ;;  %v1327_v26 = vld [vmem:[%s1417_s8 + $0x68] sm:$0xff]  }
  0x26   : > { %1205 = vmatprep.subr.bf16.mxu0 %v1308_v3  ;;  %v1328_v27 = vld [vmem:[%s1417_s8 + $0x70] sm:$0xff]   ;;  %v1329_v28 = vld [vmem:[%s1417_s8 + $0x78] sm:$0xff]   ;;  %v1336_v30 = vld [vmem:[%s1427_s17 + $0x8] sm:$0xff]  }
  0x27   : > { %v1335_v29 = vld [vmem:[%s1427_s17 + $0x10] sm:$0xff]   ;;  %v1337_v31 = vld [vmem:[%s1427_s17] sm:$0xff]  }
  0x28   : > { %1252 = vmatpush3.bf16.msra.mxu1 %v1331_v9  ;;  %v1456_v34 = vld [vmem:[%s311_s21] ss:$0 sm:$0xff] }
  0x29   : > { %1206 = vmatpush3.bf16.msra.mxu0 %v1308_v3  ;;  %1253 = vmatprep.subr.bf16.mxu1 %v1332_v11 }
  0x2a   : > { %1207 = vmatprep.subr.bf16.mxu0 %v1309_v4 }
  0x2c   : > { %1254 = vmatpush3.bf16.msra.mxu1 %v1332_v11 }
  0x2d   : > { %1208 = vmatpush3.bf16.msra.mxu0 %v1309_v4  ;;  %1255 = vmatprep.subr.bf16.mxu1 %v1333_v12 }
  0x2e   : > { %1209 = vmatprep.subr.bf16.mxu0 %v1310_v5 }
  0x30   : > { %1256 = vmatpush3.bf16.msra.mxu1 %v1333_v12 }
  0x31   : > { %1210 = vmatpush3.bf16.msra.mxu0 %v1310_v5  ;;  %1257 = vmatprep.subr.bf16.mxu1 %v1334_v15 }
  0x32   : > { %1211 = vmatprep.subr.bf16.mxu0 %v1311_v6 }
  0x34   : > { %1258 = vmatpush3.bf16.msra.mxu1 %v1334_v15 }
  0x35   : > { %1212 = vmatpush3.bf16.msra.mxu0 %v1311_v6  ;;  %1259 = vmatprep.subr.bf16.mxu1 %v1335_v29 }
  0x36   : > { %1213 = vmatprep.subr.bf16.mxu0 %v1312_v7 }
  0x38   : > { %1260 = vmatpush3.bf16.msra.mxu1 %v1335_v29 }
  0x39   : > { %1214 = vmatpush3.bf16.msra.mxu0 %v1312_v7  ;;  %1261 = vmatprep.subr.bf16.mxu1 %v1336_v30 }
  0x3a   : > { %1215 = vmatprep.subr.bf16.mxu0 %v1313_v10 }
  0x3c   : > { %1262 = vmatpush3.bf16.msra.mxu1 %v1336_v30 }
  0x3d   : > { %1216 = vmatpush3.bf16.msra.mxu0 %v1313_v10  ;;  %1263 = vmatprep.subr.bf16.mxu1 %v1337_v31 }
  0x40   : > { %1218 = vmatmul.mubr.bf16.vlgmr.msra.gmra.mxu0 %v1315_v13  ;;  %1264 = vmatpush3.bf16.msra.mxu1 %v1337_v31 }
  0x41   : > { %1221 = vmatprep.mubr.bf16.mxu0 %v1316_v14 }
  0x48   : > { %1222 = vmatmul.mubr.bf16.gmra.mxu0 %v1317_v16 }
  0x49   : > { %1225 = vmatprep.mubr.bf16.mxu0 %v1318_v17 }
  0x50   : > { %1226 = vmatmul.mubr.bf16.gmra.mxu0 %v1319_v18 }
  0x51   : > { %1229 = vmatprep.mubr.bf16.mxu0 %v1320_v19 }
  0x58   : > { %1230 = vmatmul.mubr.bf16.gmra.mxu0 %v1321_v20 }
  0x59   : > { %1233 = vmatprep.mubr.bf16.mxu0 %v1322_v21 }
  0x60   : > { %1234 = vmatmul.mubr.bf16.gmra.mxu0 %v1323_v22 }
  0x61   : > { %1237 = vmatprep.mubr.bf16.mxu0 %v1324_v23 }
  0x68   : > { %1238 = vmatmul.mubr.bf16.gmra.mxu0 %v1325_v24 }
  0x69   : > { %1241 = vmatprep.mubr.bf16.mxu0 %v1326_v25 }
  0x70   : > { %1242 = vmatmul.mubr.bf16.gmra.mxu0 %v1327_v26 }
  0x71   : > { %1245 = vmatprep.mubr.bf16.mxu0 %v1328_v27 }
  0x78   : > { %1246 = vmatmul.mubr.bf16.gmra.mxu0 %v1329_v28 }
 0x100   : > { %v1219_v32 = vpop.f32.mrf.mxu0 }
 0x101   : > { %v574_v38 = vadd.f32 %v1219_v32, %v1456_v34 }
 0x102   : > { %v565_v33 = vpop.f32.mrf.mxu0 }
 0x103   : > { %v566_v36 = vadd.f32 %v1456_v34, %v565_v33  ;;  %v694_v45 = vmax.f32 %v574_v38, 0.0 }
 0x104   : > { %v1220_v35 = vpop.f32.mrf.mxu0 }
 0x105   : > { %v577_v37 = vadd.f32 %v1220_v35, %v1456_v34  ;;  %v692_v43 = vmax.f32 %v566_v36, 0.0 }
 0x106   : > { %v568_v39 = vpop.f32.mrf.mxu0 }
 0x107   : > { %v569_v40 = vadd.f32 %v1456_v34, %v568_v39  ;;  %v695_v41 = vmax.f32 %v577_v37, 0.0 }
 0x108   : > { %v1223_v42 = vpop.f32.mrf.mxu0 }
 0x109   : > { %v693_v44 = vmax.f32 %v569_v40, 0.0  ;;  %v725_v48 = vpack.c.bf16 %v695_v41, %v694_v45  ;;  %v590_v52 = vadd.f32 %v1223_v42, %v1456_v34 }
 0x10a   : > { %v581_v46 = vpop.f32.mrf.mxu0 }
 0x10b   : > { %v724_v47 = vpack.c.bf16 %v693_v44, %v692_v43  ;;  %v582_v50 = vadd.f32 %v1456_v34, %v581_v46  ;;  %v698_v59 = vmax.f32 %v590_v52, 0.0 }
 0x10c   : > { %v1224_v49 = vpop.f32.mrf.mxu0 }
 0x10d   : > { %v593_v51 = vadd.f32 %v1224_v49, %v1456_v34  ;;  %1265 = vmatprep.mubr.bf16.mxu1 %v724_v47  ;;  %v696_v57 = vmax.f32 %v582_v50, 0.0 }
 0x10e   : > { %v584_v53 = vpop.f32.mrf.mxu0  ;;  %1266 = vmatmul.mubr.bf16.vlgmr.msra.gmra.mxu1 %v725_v48 }
 0x10f   : > { %v585_v54 = vadd.f32 %v1456_v34, %v584_v53  ;;  %v699_v55 = vmax.f32 %v593_v51, 0.0 }
 0x110   : > { %v1227_v56 = vpop.f32.mrf.mxu0 }
 0x111   : > { %v697_v58 = vmax.f32 %v585_v54, 0.0  ;;  %v727_v62 = vpack.c.bf16 %v699_v55, %v698_v59  ;;  %v606_v2 = vadd.f32 %v1227_v56, %v1456_v34 }
 0x112   : > { %v597_v60 = vpop.f32.mrf.mxu0 }
 0x113   : > { %v726_v61 = vpack.c.bf16 %v697_v58, %v696_v57  ;;  %v598_v0 = vadd.f32 %v1456_v34, %v597_v60  ;;  %v702_v9 = vmax.f32 %v606_v2, 0.0 }
 0x114   : > { %v1228_v63 = vpop.f32.mrf.mxu0 }
 0x115   : > { %v609_v1 = vadd.f32 %v1228_v63, %v1456_v34  ;;  %1269 = vmatprep.mubr.bf16.mxu1 %v726_v61  ;;  %v700_v7 = vmax.f32 %v598_v0, 0.0 }
 0x116   : > { %v600_v3 = vpop.f32.mrf.mxu0  ;;  %1270 = vmatmul.mubr.bf16.gmra.mxu1 %v727_v62 }
 0x117   : > { %v601_v4 = vadd.f32 %v1456_v34, %v600_v3  ;;  %v703_v5 = vmax.f32 %v609_v1, 0.0 }
 0x118   : > { %v1231_v6 = vpop.f32.mrf.mxu0 }
 0x119   : > { %v701_v8 = vmax.f32 %v601_v4, 0.0  ;;  %v729_v12 = vpack.c.bf16 %v703_v5, %v702_v9  ;;  %v622_v16 = vadd.f32 %v1231_v6, %v1456_v34 }
 0x11a   : > { %v613_v10 = vpop.f32.mrf.mxu0 }
 0x11b   : > { %v728_v11 = vpack.c.bf16 %v701_v8, %v700_v7  ;;  %v614_v14 = vadd.f32 %v1456_v34, %v613_v10  ;;  %v706_v23 = vmax.f32 %v622_v16, 0.0 }
 0x11c   : > { %v1232_v13 = vpop.f32.mrf.mxu0 }
 0x11d   : > { %v625_v15 = vadd.f32 %v1232_v13, %v1456_v34  ;;  %1273 = vmatprep.mubr.bf16.mxu1 %v728_v11  ;;  %v704_v21 = vmax.f32 %v614_v14, 0.0 }
 0x11e   : > { %v616_v17 = vpop.f32.mrf.mxu0  ;;  %1274 = vmatmul.mubr.bf16.gmra.mxu1 %v729_v12 }
 0x11f   : > { %v617_v18 = vadd.f32 %v1456_v34, %v616_v17  ;;  %v707_v19 = vmax.f32 %v625_v15, 0.0 }
 0x120   : > { %v1235_v20 = vpop.f32.mrf.mxu0 }
 0x121   : > { %v705_v22 = vmax.f32 %v617_v18, 0.0  ;;  %v731_v26 = vpack.c.bf16 %v707_v19, %v706_v23  ;;  %v638_v30 = vadd.f32 %v1235_v20, %v1456_v34  ;;  %v1495_v18 = vld [vmem:[%s323_s25] ss:$0 sm:$0xff] }
 0x122   : > { %v629_v24 = vpop.f32.mrf.mxu0 }
 0x123   : > { %v730_v25 = vpack.c.bf16 %v705_v22, %v704_v21  ;;  %v630_v28 = vadd.f32 %v1456_v34, %v629_v24  ;;  %v710_v38 = vmax.f32 %v638_v30, 0.0 }
 0x124   : > { %v1236_v27 = vpop.f32.mrf.mxu0 }
 0x125   : > { %v641_v29 = vadd.f32 %v1236_v27, %v1456_v34  ;;  %1277 = vmatprep.mubr.bf16.mxu1 %v730_v25  ;;  %v708_v36 = vmax.f32 %v630_v28, 0.0 }
 0x126   : > { %v632_v31 = vpop.f32.mrf.mxu0  ;;  %1278 = vmatmul.mubr.bf16.gmra.mxu1 %v731_v26 }
 0x127   : > { %v633_v32 = vadd.f32 %v1456_v34, %v632_v31  ;;  %v711_v33 = vmax.f32 %v641_v29, 0.0 }
 0x128   : > { %v1239_v35 = vpop.f32.mrf.mxu0 }
 0x129   : > { %v709_v37 = vmax.f32 %v633_v32, 0.0  ;;  %v733_v41 = vpack.c.bf16 %v711_v33, %v710_v38  ;;  %v654_v45 = vadd.f32 %v1239_v35, %v1456_v34 }
 0x12a   : > { %v645_v39 = vpop.f32.mrf.mxu0 }
 0x12b   : > { %v732_v40 = vpack.c.bf16 %v709_v37, %v708_v36  ;;  %v646_v43 = vadd.f32 %v1456_v34, %v645_v39  ;;  %v714_v52 = vmax.f32 %v654_v45, 0.0 }
 0x12c   : > { %v1240_v42 = vpop.f32.mrf.mxu0 }
 0x12d   : > { %v657_v44 = vadd.f32 %v1240_v42, %v1456_v34  ;;  %1281 = vmatprep.mubr.bf16.mxu1 %v732_v40  ;;  %v712_v50 = vmax.f32 %v646_v43, 0.0 }
 0x12e   : > { %v648_v46 = vpop.f32.mrf.mxu0  ;;  %1282 = vmatmul.mubr.bf16.gmra.mxu1 %v733_v41 }
 0x12f   : > { %v649_v47 = vadd.f32 %v1456_v34, %v648_v46  ;;  %v715_v48 = vmax.f32 %v657_v44, 0.0 }
 0x130   : > { %v1243_v49 = vpop.f32.mrf.mxu0 }
 0x131   : > { %v713_v51 = vmax.f32 %v649_v47, 0.0  ;;  %v735_v55 = vpack.c.bf16 %v715_v48, %v714_v52  ;;  %v670_v59 = vadd.f32 %v1243_v49, %v1456_v34 }
 0x132   : > { %v661_v53 = vpop.f32.mrf.mxu0 }
 0x133   : > { %v734_v54 = vpack.c.bf16 %v713_v51, %v712_v50  ;;  %v662_v57 = vadd.f32 %v1456_v34, %v661_v53  ;;  %v718_v2 = vmax.f32 %v670_v59, 0.0 }
 0x134   : > { %v1244_v56 = vpop.f32.mrf.mxu0 }
 0x135   : > { %v673_v58 = vadd.f32 %v1244_v56, %v1456_v34  ;;  %1285 = vmatprep.mubr.bf16.mxu1 %v734_v54  ;;  %v716_v0 = vmax.f32 %v662_v57, 0.0 }
 0x136   : > { %v664_v60 = vpop.f32.mrf.mxu0  ;;  %1286 = vmatmul.mubr.bf16.gmra.mxu1 %v735_v55 }
 0x137   : > { %v665_v61 = vadd.f32 %v1456_v34, %v664_v60  ;;  %v719_v62 = vmax.f32 %v673_v58, 0.0 }
 0x138   : > { %v1247_v63 = vpop.f32.mrf.mxu0 }
 0x139   : > { %v717_v1 = vmax.f32 %v665_v61, 0.0  ;;  %v737_v5 = vpack.c.bf16 %v719_v62, %v718_v2  ;;  %v686_v9 = vadd.f32 %v1247_v63, %v1456_v34 }
 0x13a   : > { %v677_v3 = vpop.f32.mrf.mxu0 }
 0x13b   : > { %v736_v4 = vpack.c.bf16 %v717_v1, %v716_v0  ;;  %v678_v7 = vadd.f32 %v1456_v34, %v677_v3  ;;  %v722_v15 = vmax.f32 %v686_v9, 0.0 }
 0x13c   : > { %v1248_v6 = vpop.f32.mrf.mxu0 }
 0x13d   : > { %v689_v8 = vadd.f32 %v1248_v6, %v1456_v34  ;;  %1289 = vmatprep.mubr.bf16.mxu1 %v736_v4  ;;  %v720_v13 = vmax.f32 %v678_v7, 0.0 }
 0x13e   : > { %v680_v10 = vpop.f32.mrf.mxu0  ;;  %1290 = vmatmul.mubr.bf16.gmra.mxu1 %v737_v5 }
 0x13f   : > { %v681_v11 = vadd.f32 %v1456_v34, %v680_v10  ;;  %v723_v12 = vmax.f32 %v689_v8, 0.0 }
 0x141   : > { %v721_v14 = vmax.f32 %v681_v11, 0.0  ;;  %v739_v17 = vpack.c.bf16 %v723_v12, %v722_v15 }
 0x143   : > { %v738_v16 = vpack.c.bf16 %v721_v14, %v720_v13 }
 0x145   : > { %1293 = vmatprep.mubr.bf16.mxu1 %v738_v16 }
 0x146   : > { %1294 = vmatmul.mubr.bf16.gmra.mxu1 %v739_v17 }
 0x1ce   : > { %v1267_v34 = vpop.f32.mrf.mxu1 }
 0x1cf   : > { %v854_v19 = vadd.f32 %v1267_v34, %v1495_v18 }
 0x1d0   : > { %v845_v20 = vpop.f32.mrf.mxu1 }
 0x1d1   : > { %974 = vst [vmem:[%s1500_s7 + $0x10] sm:$0xff] %v854_v19  ;;  %v846_v21 = vadd.f32 %v1495_v18, %v845_v20 }
 0x1d2   : > { %v1268_v22 = vpop.f32.mrf.mxu1 }
 0x1d3   : > { %972 = vst [vmem:[%s1500_s7] sm:$0xff] %v846_v21  ;;  %v857_v23 = vadd.f32 %v1268_v22, %v1495_v18 }
 0x1d4   : > { %v848_v24 = vpop.f32.mrf.mxu1 }
 0x1d5   : > { %975 = vst [vmem:[%s1500_s7 + $0x18] sm:$0xff] %v857_v23  ;;  %v849_v25 = vadd.f32 %v1495_v18, %v848_v24 }
 0x1d6   : > { %v1271_v26 = vpop.f32.mrf.mxu1 }
 0x1d7   : > { %973 = vst [vmem:[%s1500_s7 + $0x8] sm:$0xff] %v849_v25  ;;  %v870_v27 = vadd.f32 %v1271_v26, %v1495_v18 }
 0x1d8   : > { %v861_v28 = vpop.f32.mrf.mxu1 }
 0x1d9   : > { %978 = vst [vmem:[%s1500_s7 + $0x30] sm:$0xff] %v870_v27  ;;  %v862_v29 = vadd.f32 %v1495_v18, %v861_v28 }
 0x1da   : > { %v1272_v30 = vpop.f32.mrf.mxu1 }
 0x1db   : > { %976 = vst [vmem:[%s1500_s7 + $0x20] sm:$0xff] %v862_v29  ;;  %v873_v31 = vadd.f32 %v1272_v30, %v1495_v18 }
 0x1dc   : > { %v864_v32 = vpop.f32.mrf.mxu1 }
 0x1dd   : > { %979 = vst [vmem:[%s1500_s7 + $0x38] sm:$0xff] %v873_v31  ;;  %v865_v33 = vadd.f32 %v1495_v18, %v864_v32 }
 0x1de   : > { %v1275_v35 = vpop.f32.mrf.mxu1 }
 0x1df   : > { %977 = vst [vmem:[%s1500_s7 + $0x28] sm:$0xff] %v865_v33  ;;  %v886_v36 = vadd.f32 %v1275_v35, %v1495_v18 }
 0x1e0   : > { %v877_v37 = vpop.f32.mrf.mxu1 }
 0x1e1   : > { %982 = vst [vmem:[%s1500_s7 + $0x50] sm:$0xff] %v886_v36  ;;  %v878_v38 = vadd.f32 %v1495_v18, %v877_v37 }
 0x1e2   : > { %v1276_v39 = vpop.f32.mrf.mxu1 }
 0x1e3   : > { %980 = vst [vmem:[%s1500_s7 + $0x40] sm:$0xff] %v878_v38  ;;  %v889_v40 = vadd.f32 %v1276_v39, %v1495_v18 }
 0x1e4   : > { %v880_v41 = vpop.f32.mrf.mxu1 }
 0x1e5   : > { %983 = vst [vmem:[%s1500_s7 + $0x58] sm:$0xff] %v889_v40  ;;  %v881_v42 = vadd.f32 %v1495_v18, %v880_v41 }
 0x1e6   : > { %v1279_v43 = vpop.f32.mrf.mxu1 }
 0x1e7   : > { %981 = vst [vmem:[%s1500_s7 + $0x48] sm:$0xff] %v881_v42  ;;  %v902_v44 = vadd.f32 %v1279_v43, %v1495_v18 }
 0x1e8   : > { %v893_v45 = vpop.f32.mrf.mxu1 }
 0x1e9   : > { %986 = vst [vmem:[%s1500_s7 + $0x70] sm:$0xff] %v902_v44  ;;  %v894_v46 = vadd.f32 %v1495_v18, %v893_v45 }
 0x1ea   : > { %v1280_v47 = vpop.f32.mrf.mxu1 }
 0x1eb   : > { %984 = vst [vmem:[%s1500_s7 + $0x60] sm:$0xff] %v894_v46  ;;  %v905_v48 = vadd.f32 %v1280_v47, %v1495_v18 }
 0x1ec   : > { %v896_v49 = vpop.f32.mrf.mxu1 }
 0x1ed   : > { %987 = vst [vmem:[%s1500_s7 + $0x78] sm:$0xff] %v905_v48  ;;  %v897_v50 = vadd.f32 %v1495_v18, %v896_v49 }
 0x1ee   : > { %v1283_v51 = vpop.f32.mrf.mxu1 }
 0x1ef   : > { %985 = vst [vmem:[%s1500_s7 + $0x68] sm:$0xff] %v897_v50  ;;  %v918_v52 = vadd.f32 %v1283_v51, %v1495_v18 }
 0x1f0   : > { %v909_v53 = vpop.f32.mrf.mxu1 }
 0x1f1   : > { %990 = vst [vmem:[%s1500_s7 + $0x90] sm:$0xff] %v918_v52  ;;  %v910_v54 = vadd.f32 %v1495_v18, %v909_v53 }
 0x1f2   : > { %v1284_v55 = vpop.f32.mrf.mxu1 }
 0x1f3   : > { %988 = vst [vmem:[%s1500_s7 + $0x80] sm:$0xff] %v910_v54  ;;  %v921_v56 = vadd.f32 %v1284_v55, %v1495_v18 }
 0x1f4   : > { %v912_v57 = vpop.f32.mrf.mxu1 }
 0x1f5   : > { %991 = vst [vmem:[%s1500_s7 + $0x98] sm:$0xff] %v921_v56  ;;  %v913_v58 = vadd.f32 %v1495_v18, %v912_v57 }
 0x1f6   : > { %v1287_v59 = vpop.f32.mrf.mxu1 }
 0x1f7   : > { %989 = vst [vmem:[%s1500_s7 + $0x88] sm:$0xff] %v913_v58  ;;  %v934_v60 = vadd.f32 %v1287_v59, %v1495_v18 }
 0x1f8   : > { %v925_v61 = vpop.f32.mrf.mxu1 }
 0x1f9   : > { %994 = vst [vmem:[%s1500_s7 + $0xb0] sm:$0xff] %v934_v60  ;;  %v926_v62 = vadd.f32 %v1495_v18, %v925_v61 }
 0x1fa   : > { %v1288_v63 = vpop.f32.mrf.mxu1 }
 0x1fb   : > { %992 = vst [vmem:[%s1500_s7 + $0xa0] sm:$0xff] %v926_v62  ;;  %v937_v0 = vadd.f32 %v1288_v63, %v1495_v18 }
 0x1fc   : > { %v928_v1 = vpop.f32.mrf.mxu1 }
 0x1fd   : > { %995 = vst [vmem:[%s1500_s7 + $0xb8] sm:$0xff] %v937_v0  ;;  %v929_v2 = vadd.f32 %v1495_v18, %v928_v1 }
 0x1fe   : > { %v1291_v3 = vpop.f32.mrf.mxu1 }
 0x1ff   : > { %993 = vst [vmem:[%s1500_s7 + $0xa8] sm:$0xff] %v929_v2  ;;  %v950_v4 = vadd.f32 %v1291_v3, %v1495_v18 }
 0x200   : > { %v941_v5 = vpop.f32.mrf.mxu1 }
 0x201   : > { %998 = vst [vmem:[%s1500_s7 + $0xd0] sm:$0xff] %v950_v4  ;;  %v942_v6 = vadd.f32 %v1495_v18, %v941_v5 }
 0x202   : > { %v1292_v7 = vpop.f32.mrf.mxu1 }
 0x203   : > { %996 = vst [vmem:[%s1500_s7 + $0xc0] sm:$0xff] %v942_v6  ;;  %v953_v8 = vadd.f32 %v1292_v7, %v1495_v18 }
 0x204   : > { %v944_v9 = vpop.f32.mrf.mxu1 }
 0x205   : > { %999 = vst [vmem:[%s1500_s7 + $0xd8] sm:$0xff] %v953_v8  ;;  %v945_v10 = vadd.f32 %v1495_v18, %v944_v9 }
 0x206   : > { %v1295_v11 = vpop.f32.mrf.mxu1 }
 0x207   : > { %997 = vst [vmem:[%s1500_s7 + $0xc8] sm:$0xff] %v945_v10  ;;  %v966_v12 = vadd.f32 %v1295_v11, %v1495_v18 }
 0x208   : > { %v957_v13 = vpop.f32.mrf.mxu1 }
 0x209   : > { %1002 = vst [vmem:[%s1500_s7 + $0xf0] sm:$0xff] %v966_v12  ;;  %v958_v14 = vadd.f32 %v1495_v18, %v957_v13 }
 0x20a   : > { %v1296_v15 = vpop.f32.mrf.mxu1 }
 0x20b   : > { %1000 = vst [vmem:[%s1500_s7 + $0xe0] sm:$0xff] %v958_v14  ;;  %v969_v16 = vadd.f32 %v1296_v15, %v1495_v18 }
 0x20c   : > { %v960_v17 = vpop.f32.mrf.mxu1 }
 0x20d   : > { %1003 = vst [vmem:[%s1500_s7 + $0xf8] sm:$0xff] %v969_v16  ;;  %v961_v34 = vadd.f32 %v1495_v18, %v960_v17 }
 0x20f   : > { %1001 = vst [vmem:[%s1500_s7 + $0xe8] sm:$0xff] %v961_v34 }
 0x210 PF: > { %s22_s26 = sadd.s32 1, %s1358_s26  }
 0x211   : > { %p19_p13 = scmp.ge.s32.totalorder %s22_s26, 4  }
 0x213   :  { %21 = sbr.rel (!%p19_p13) target bundleno = 16 (0x10), region = 82 }

</bundles_post_ra>
